<compile_context>
chip_gen: v6e
topology: v6e:2x2x1
jax: 0.10.0
libtpu: 0.0.40
codegen_flags: <defaults>
</compile_context>

<pallas_src>
import functools

import numpy as np

import jax
import jax.numpy as jnp
from jax import lax
from jax.experimental import pallas as pl
from jax.experimental.pallas import tpu as pltpu


# ---------------------------------------------------------------------------
# Fused kernel: whole Block forward for one batch-block of `nb` images in the
# packed layout (rows = nb*H, lanes = W*C).
# ---------------------------------------------------------------------------
def _block_kernel(x_ref, m1_ref, m2_ref, bn12_ref, rm_ref, lm_ref,
                  rre_ref, cce_ref, skw_ref, bnsk_ref, out_ref,
                  *, cout, rows_half):
    f32 = jnp.float32
    BIG = jnp.float32(1e30)            # stands in for inf in maxpool edge masking

    def mm(a, b):
        # DEFAULT precision: single-pass bf16 MXU matmul with f32 accumulation.
        # (Selection matrices are 0/1 and exact in bf16.)
        return jnp.dot(a, b, preferred_element_type=f32)

    def roll(v, shift, axis):
        # positive-shift form of jnp.roll semantics: out[i] = in[(i-shift) % n]
        return pltpu.roll(v, shift=shift % v.shape[axis], axis=axis)

    x = x_ref[...]                     # (R, W*Cin), R = nb*H
    mt = rm_ref[0]                     # (R, 1): 0.0 at each image's first row
    mb = rm_ref[1]                     # (R, 1): 0.0 at each image's last row

    # ReLU -> SepConv(3x3, pad 1) -> BN.  Row taps via XLU sublane rolls +
    # per-image edge masks (zero padding); column taps + pointwise 1x1 are
    # folded host-side into m_ref[dy].  3 MXU matmuls per stage.
    def sepconv_bn(a, m_ref, scale, bias):
        a_prev = roll(a, 1, 0) * mt            # row y-1 (zeroed at image top)
        a_next = roll(a, -1, 0) * mb           # row y+1 (zeroed at image bottom)
        h = mm(a, m_ref[1]) + mm(a_prev, m_ref[0]) + mm(a_next, m_ref[2])
        return h * scale + bias

    # ---- rep branch -------------------------------------------------------
    a1 = jnp.maximum(x, 0.0)
    h1 = sepconv_bn(a1, m1_ref, bn12_ref[0], bn12_ref[1])
    a2 = jnp.maximum(h1, 0.0)
    h2 = sepconv_bn(a2, m2_ref, bn12_ref[2], bn12_ref[3])       # (R, W*Cout)

    # ---- MaxPool 3x3 / stride 2 / pad 1, computed directly at Ho x Wo ------
    # vertical taps: sublane rolls + VPU max (-BIG == -inf padding per image)
    v = jnp.maximum(h2, roll(h2, 1, 0) * mt + (mt - 1.0) * BIG)
    v = jnp.maximum(v, roll(h2, -1, 0) * mb + (mb - 1.0) * BIG)
    v = mm(rre_ref[...], v)            # keep rows 2i of every image -> (R/2, W*Cout)
    # horizontal taps: lane rolls by +-Cout + edge masks
    lml = lm_ref[0]                    # (1, W*Cout): 0.0 on the first Cout lanes
    lmr = lm_ref[1]                    # (1, W*Cout): 0.0 on the last  Cout lanes
    u = jnp.maximum(v, roll(v, cout, 1) * lml + (lml - 1.0) * BIG)
    u = jnp.maximum(u, roll(v, -cout, 1) * lmr + (lmr - 1.0) * BIG)
    rep = mm(u, cce_ref[...])          # keep cols 2j -> (R/2, Wo*Cout)

    # ---- skip branch: 1x1 conv, stride 2, + BN on the raw input -----------
    xs = x_ref[pl.ds(0, rows_half, 2), :]      # even rows via strided sublane load
    skip = mm(xs, skw_ref[...]) * bnsk_ref[0] + bnsk_ref[1]

    out_ref[...] = (rep + skip).astype(out_ref.dtype)


# ---------------------------------------------------------------------------
# Host-side constant builders (weight / shape only; built once per param set)
# ---------------------------------------------------------------------------
def _col_shift_bands_np(w):
    """b[dx][src, dst] = 1 iff src == dst + dx - 1 (zero-padded column shift)."""
    b = np.zeros((3, w, w), np.float32)
    for d in range(3):
        for c in range(w):
            src = c + d - 1
            if 0 <= src < w:
                b[d, src, c] = 1.0
    return b


def _stride2_col_np(w, wo):
    s = np.zeros((w, wo), np.float32)
    s[2 * np.arange(wo), np.arange(wo)] = 1.0
    return s


def _even_row_select_np(nb, h):
    """Block-diagonal over the folded batch: picks row 2i of every image."""
    ho = h // 2
    r = np.zeros((nb * ho, nb * h), np.float32)
    for b in range(nb):
        for i in range(ho):
            r[b * ho + i, b * h + 2 * i] = 1.0
    return r


def _even_col_select_np(w, c):
    """Picks packed column group 2j (identity over the C channel lanes)."""
    wo = w // 2
    s = np.zeros((w * c, wo * c), np.float32)
    for j in range(wo):
        s[2 * j * c:(2 * j + 1) * c, j * c:(j + 1) * c] = np.eye(c, dtype=np.float32)
    return s


def _row_masks_np(nb, h):
    """[0]: 0.0 at each image's first row; [1]: 0.0 at each image's last row."""
    m = np.ones((2, nb * h, 1), np.float32)
    m[0, ::h, 0] = 0.0
    m[1, h - 1::h, 0] = 0.0
    return m


def _lane_masks_np(w, c):
    """[0]: 0.0 on the first C lanes (w==0); [1]: 0.0 on the last C lanes."""
    m = np.ones((2, 1, w * c), np.float32)
    m[0, 0, :c] = 0.0
    m[1, 0, (w - 1) * c:] = 0.0
    return m


def choose_block_batch(n, h, *, max_rows=256, min_blocks=2):
    """Images folded per grid block: fill MXU rows (<=256) while keeping >=2
    parallel grid blocks when the batch allows it (v7x dual TensorCore)."""
    nb = max(1, min(max_rows // h, n // min_blocks if n >= min_blocks else n))
    while n % nb:
        nb -= 1
    return nb


def prepare_block_constants(params, *, H, W, nb):
    """Weight-only folding into the kernel's constant operands.  Call ONCE per
    parameter set (hoisted off the per-forward hot path)."""
    Cin, Cout = params["pw1"].shape
    Wo = W // 2
    hi = lax.Precision.HIGHEST            # one-time prep, keep it exact
    Bcol = jnp.asarray(_col_shift_bands_np(W))

    def fold_sepconv(dw9, pw, cin):
        # depthwise taps x pointwise 1x1, zero-padded column shift folded in.
        g = dw9.reshape(3, 3, cin)[:, :, :, None] * pw[None, None, :, :]
        m = jnp.einsum("dpw,ydio->ypiwo", Bcol, g, precision=hi)
        return m.reshape(3, W * cin, W * pw.shape[1])

    skw = jnp.einsum("wj,io->wijo", jnp.asarray(_stride2_col_np(W, Wo)),
                     params["skip_w"], precision=hi).reshape(W * Cin, Wo * Cout)
    return {
        "m1": fold_sepconv(params["dw1"], params["pw1"], Cin),      # (3, W*Cin,  W*Cout)
        "m2": fold_sepconv(params["dw2"], params["pw2"], Cout),     # (3, W*Cout, W*Cout)
        "bn12": jnp.stack([jnp.tile(params["bn1_scale"], (1, W)),
                           jnp.tile(params["bn1_bias"], (1, W)),
                           jnp.tile(params["bn2_scale"], (1, W)),
                           jnp.tile(params["bn2_bias"], (1, W))]),  # (4, 1, W*Cout)
        "rowmask": jnp.asarray(_row_masks_np(nb, H)),               # (2, nb*H, 1)
        "lanemask": jnp.asarray(_lane_masks_np(W, Cout)),           # (2, 1, W*Cout)
        "rre": jnp.asarray(_even_row_select_np(nb, H)),             # (nb*Ho, nb*H)
        "cce": jnp.asarray(_even_col_select_np(W, Cout)),           # (W*Cout, Wo*Cout)
        "skw": skw,                                                 # (W*Cin, Wo*Cout)
        "bnsk": jnp.stack([jnp.tile(params["skipbn_scale"], (1, Wo)),
                           jnp.tile(params["skipbn_bias"], (1, Wo))]),  # (2,1,Wo*Cout)
    }


def _const_spec(shape):
    zeros = (0,) * len(shape)
    return pl.BlockSpec(shape, lambda g, _z=zeros: _z)


# ---------------------------------------------------------------------------
# Hot-path API: packed layout in/out.  x2d is (N*H, W*Cin) with channel-
# interleaved lanes [w*Cin + ci]; output is (N*Ho, Wo*Cout).  When stacking
# Blocks, keep this layout end-to-end instead of round-tripping through NCHW.
# ---------------------------------------------------------------------------
@functools.partial(jax.jit, static_argnames=("nb", "h", "w", "cin", "cout"))
def block_forward_packed(x2d, consts, *, nb, h, w, cin, cout):
    n_img = x2d.shape[0] // h
    assert x2d.shape == (n_img * h, w * cin) and n_img % nb == 0
    assert h % 2 == 0 and w % 2 == 0
    ho, wo = h // 2, w // 2
    rb, rbo = nb * h, nb * ho

    kernel = functools.partial(_block_kernel, cout=cout, rows_half=rbo)
    names = ("m1", "m2", "bn12", "rowmask", "lanemask", "rre", "cce", "skw", "bnsk")
    return pl.pallas_call(
        kernel,
        out_shape=jax.ShapeDtypeStruct((n_img * ho, wo * cout), jnp.float32),
        grid=(n_img // nb,),
        in_specs=[pl.BlockSpec((rb, w * cin), lambda g: (g, 0))]
                 + [_const_spec(consts[k].shape) for k in names],
        out_specs=pl.BlockSpec((rbo, wo * cout), lambda g: (g, 0)),
        compiler_params=pltpu.CompilerParams(dimension_semantics=("parallel",)),
    )(x2d, *[consts[k] for k in names])


def block_forward_nchw(x_nchw, consts, *, nb, cout):
    """Convenience wrapper: NCHW in/out (layout glue kept outside the kernel)."""
    n, cin, h, w = x_nchw.shape
    x2d = jnp.transpose(x_nchw, (0, 2, 3, 1)).reshape(n * h, w * cin)
    x2d = x2d.astype(jnp.float32)
    out2d = block_forward_packed(x2d, consts, nb=nb, h=h, w=w, cin=cin, cout=cout)
    return jnp.transpose(out2d.reshape(n, h // 2, w // 2, cout), (0, 3, 1, 2))


# ---------------------------------------------------------------------------
# Deterministic parameter init (shapes follow the PyTorch module __init__)
# ---------------------------------------------------------------------------
def _fold_bn(gamma, beta, mean, var, eps=1e-5):
    scale = gamma / jnp.sqrt(var + eps)
    bias = beta - mean * scale
    return scale[None, :], bias[None, :]                   # (1, C) each


def init_params(key, cin, cout):
    ks = jax.random.split(key, 8)

    def bn_params(k, c):
        k1, k2, k3, k4 = jax.random.split(k, 4)
        gamma = 1.0 + 0.1 * jax.random.normal(k1, (c,), jnp.float32)
        beta = 0.1 * jax.random.normal(k2, (c,), jnp.float32)
        mean = 0.1 * jax.random.normal(k3, (c,), jnp.float32)
        var = jax.random.uniform(k4, (c,), jnp.float32, 0.5, 1.5)
        return _fold_bn(gamma, beta, mean, var)

    p = {}
    # SeparableConv2d #1: depthwise (cin,1,3,3) stored as (9, cin) [tap dy*3+dx];
    # pointwise (cin, cout)
    p["dw1"] = 0.3 * jax.random.normal(ks[0], (9, cin), jnp.float32)
    p["pw1"] = 0.3 * jax.random.normal(ks[1], (cin, cout), jnp.float32)
    p["bn1_scale"], p["bn1_bias"] = bn_params(ks[2], cout)
    # SeparableConv2d #2
    p["dw2"] = 0.3 * jax.random.normal(ks[3], (9, cout), jnp.float32)
    p["pw2"] = 0.3 * jax.random.normal(ks[4], (cout, cout), jnp.float32)
    p["bn2_scale"], p["bn2_bias"] = bn_params(ks[5], cout)
    # skip 1x1 conv (cout, cin, 1, 1) stored as (cin, cout) + skip BN
    p["skip_w"] = 0.3 * jax.random.normal(ks[6], (cin, cout), jnp.float32)
    p["skipbn_scale"], p["skipbn_bias"] = bn_params(ks[7], cout)
    return p


# ---------------------------------------------------------------------------
# Pure-JAX reference (mirrors the PyTorch forward, NCHW) for verification
# ---------------------------------------------------------------------------
def block_reference(x_nchw, params, *, strides=2):
    x = x_nchw.astype(jnp.float32)
    hi = lax.Precision.HIGHEST

    def dwconv(h, dw9):
        c = h.shape[1]
        w = dw9.reshape(3, 3, c).transpose(2, 0, 1)[:, None, :, :]     # (C,1,3,3)
        return lax.conv_general_dilated(
            h, w, window_strides=(1, 1), padding=[(1, 1), (1, 1)],
            dimension_numbers=("NCHW", "OIHW", "NCHW"),
            feature_group_count=c, precision=hi)

    def pwconv(h, pw, stride=1):
        w = pw.T[:, :, None, None]                                     # (Cout,Cin,1,1)
        return lax.conv_general_dilated(
            h, w, window_strides=(stride, stride), padding=[(0, 0), (0, 0)],
            dimension_numbers=("NCHW", "OIHW", "NCHW"), precision=hi)

    def bn(h, scale, bias):
        return h * scale[0][None, :, None, None] + bias[0][None, :, None, None]

    h = jnp.maximum(x, 0.0)
    h = bn(pwconv(dwconv(h, params["dw1"]), params["pw1"]),
           params["bn1_scale"], params["bn1_bias"])
    h = jnp.maximum(h, 0.0)
    h = bn(pwconv(dwconv(h, params["dw2"]), params["pw2"]),
           params["bn2_scale"], params["bn2_bias"])
    if strides != 1:
        h = lax.reduce_window(h, -jnp.inf, lax.max,
                              (1, 1, 3, 3), (1, 1, strides, strides),
                              [(0, 0), (0, 0), (1, 1), (1, 1)])
    skip = bn(pwconv(x, params["skip_w"], stride=strides),
              params["skipbn_scale"], params["skipbn_bias"])
    return h + skip


# ---------------------------------------------------------------------------
if __name__ == "__main__":
    N, Cin, Cout, H, W = 2, 4, 8, 16, 16

    key = jax.random.PRNGKey(0)
    kx, kp = jax.random.split(key)
    x = jax.random.normal(kx, (N, Cin, H, W), jnp.float32)
    params = init_params(kp, Cin, Cout)

    nb = choose_block_batch(N, H)                 # N=2 -> nb=1, grid=(2,) ("parallel")
    consts = prepare_block_constants(params, H=H, W=W, nb=nb)   # once per weight set

    out = jax.block_until_ready(block_forward_nchw(x, consts, nb=nb, cout=Cout))
    ref = jax.block_until_ready(block_reference(x, params, strides=2))

    assert out.shape == (N, Cout, H // 2, W // 2), out.shape
    max_err = float(jnp.max(jnp.abs(out - ref)))
    # Kernel matmuls run at DEFAULT (single-pass bf16 MXU) precision while the
    # reference is HIGHEST-precision f32, so allow bf16-level relative error.
    tol = 3e-2 * (1.0 + float(jnp.max(jnp.abs(ref))))
    if max_err > tol:
        raise AssertionError(f"mismatch vs reference: max abs err {max_err} > tol {tol}")
    print("KERNEL_OK")
</pallas_src>

<mosaic_0001>
module attributes {stable_mosaic.version = 11 : i64} {
  func.func @_block_kernel(%arg0: i32, %arg1: memref<16x64xf32, #tpu.memory_space<vmem>>, %arg2: memref<3x64x128xf32, #tpu.memory_space<vmem>>, %arg3: memref<3x128x128xf32, #tpu.memory_space<vmem>>, %arg4: memref<4x1x128xf32, #tpu.memory_space<vmem>>, %arg5: memref<2x16x1xf32, #tpu.memory_space<vmem>>, %arg6: memref<2x1x128xf32, #tpu.memory_space<vmem>>, %arg7: memref<8x16xf32, #tpu.memory_space<vmem>>, %arg8: memref<128x64xf32, #tpu.memory_space<vmem>>, %arg9: memref<64x64xf32, #tpu.memory_space<vmem>>, %arg10: memref<2x1x64xf32, #tpu.memory_space<vmem>>, %arg11: memref<8x64xf32, #tpu.memory_space<vmem>>) attributes {dimension_semantics = [#tpu.dimension_semantics<parallel>], iteration_bounds = array<i64: 2>, scalar_prefetch = 0 : i64, scratch_operands = 0 : i64, tpu.core_type = #tpu.core_type<tc>, window_params = [{transform_indices = @transform_0, window_bounds = array<i64: 16, 64>}, {pipeline_mode = #tpu.pipeline_mode<synchronous>, transform_indices = @transform_1, window_bounds = array<i64: 3, 64, 128>}, {pipeline_mode = #tpu.pipeline_mode<synchronous>, transform_indices = @transform_2, window_bounds = array<i64: 3, 128, 128>}, {pipeline_mode = #tpu.pipeline_mode<synchronous>, transform_indices = @transform_3, window_bounds = array<i64: 4, 1, 128>}, {pipeline_mode = #tpu.pipeline_mode<synchronous>, transform_indices = @transform_4, window_bounds = array<i64: 2, 16, 1>}, {pipeline_mode = #tpu.pipeline_mode<synchronous>, transform_indices = @transform_5, window_bounds = array<i64: 2, 1, 128>}, {pipeline_mode = #tpu.pipeline_mode<synchronous>, transform_indices = @transform_6, window_bounds = array<i64: 8, 16>}, {pipeline_mode = #tpu.pipeline_mode<synchronous>, transform_indices = @transform_7, window_bounds = array<i64: 128, 64>}, {pipeline_mode = #tpu.pipeline_mode<synchronous>, transform_indices = @transform_8, window_bounds = array<i64: 64, 64>}, {pipeline_mode = #tpu.pipeline_mode<synchronous>, transform_indices = @transform_9, window_bounds = array<i64: 2, 1, 64>}, {transform_indices = @transform_10, window_bounds = array<i64: 8, 64>}]} {
    %c0 = arith.constant 0 : index
    %c0_0 = arith.constant 0 : index
    %0 = vector.load %arg1[%c0, %c0_0] : memref<16x64xf32, #tpu.memory_space<vmem>>, vector<16x64xf32>
    %c0_1 = arith.constant 0 : index
    %c0_2 = arith.constant 0 : index
    %c0_3 = arith.constant 0 : index
    %1 = vector.load %arg5[%c0_1, %c0_2, %c0_3] : memref<2x16x1xf32, #tpu.memory_space<vmem>>, vector<1x16x1xf32>
    %2 = vector.shape_cast %1 : vector<1x16x1xf32> to vector<16x1xf32>
    %c1 = arith.constant 1 : index
    %c0_4 = arith.constant 0 : index
    %c0_5 = arith.constant 0 : index
    %3 = vector.load %arg5[%c1, %c0_4, %c0_5] : memref<2x16x1xf32, #tpu.memory_space<vmem>>, vector<1x16x1xf32>
    %4 = vector.shape_cast %3 : vector<1x16x1xf32> to vector<16x1xf32>
    %cst = arith.constant 0.000000e+00 : f32
    %5 = vector.broadcast %cst : f32 to vector<16x64xf32>
    %6 = arith.maximumf %0, %5 : vector<16x64xf32>
    %c0_6 = arith.constant 0 : index
    %c0_7 = arith.constant 0 : index
    %c0_8 = arith.constant 0 : index
    %7 = vector.load %arg4[%c0_6, %c0_7, %c0_8] : memref<4x1x128xf32, #tpu.memory_space<vmem>>, vector<1x1x128xf32>
    %8 = vector.shape_cast %7 : vector<1x1x128xf32> to vector<1x128xf32>
    %c1_9 = arith.constant 1 : index
    %c0_10 = arith.constant 0 : index
    %c0_11 = arith.constant 0 : index
    %9 = vector.load %arg4[%c1_9, %c0_10, %c0_11] : memref<4x1x128xf32, #tpu.memory_space<vmem>>, vector<1x1x128xf32>
    %10 = vector.shape_cast %9 : vector<1x1x128xf32> to vector<1x128xf32>
    %c1_i32 = arith.constant 1 : i32
    %11 = tpu.dynamic_rotate %6 by %c1_i32 dim 0 : vector<16x64xf32>, i32 -> vector<16x64xf32>
    %12 = vector.broadcast %2 : vector<16x1xf32> to vector<16x64xf32>
    %13 = arith.mulf %11, %12 : vector<16x64xf32>
    %c15_i32 = arith.constant 15 : i32
    %14 = tpu.dynamic_rotate %6 by %c15_i32 dim 0 : vector<16x64xf32>, i32 -> vector<16x64xf32>
    %15 = vector.broadcast %4 : vector<16x1xf32> to vector<16x64xf32>
    %16 = arith.mulf %14, %15 : vector<16x64xf32>
    %c1_12 = arith.constant 1 : index
    %c0_13 = arith.constant 0 : index
    %c0_14 = arith.constant 0 : index
    %17 = vector.load %arg2[%c1_12, %c0_13, %c0_14] : memref<3x64x128xf32, #tpu.memory_space<vmem>>, vector<1x64x128xf32>
    %18 = vector.shape_cast %17 : vector<1x64x128xf32> to vector<64x128xf32>
    %cst_15 = arith.constant dense<0.000000e+00> : vector<16x128xf32>
    %19 = tpu.matmul %6, %18, %cst_15 {dimension_numbers = #tpu.dot_dimension_numbers<[1], [0], [0], [1], [0, 0, 1, 1], [], []>} : vector<16x64xf32>, vector<64x128xf32>, vector<16x128xf32> -> vector<16x128xf32>
    %c0_16 = arith.constant 0 : index
    %c0_17 = arith.constant 0 : index
    %c0_18 = arith.constant 0 : index
    %20 = vector.load %arg2[%c0_16, %c0_17, %c0_18] : memref<3x64x128xf32, #tpu.memory_space<vmem>>, vector<1x64x128xf32>
    %21 = vector.shape_cast %20 : vector<1x64x128xf32> to vector<64x128xf32>
    %cst_19 = arith.constant dense<0.000000e+00> : vector<16x128xf32>
    %22 = tpu.matmul %13, %21, %cst_19 {dimension_numbers = #tpu.dot_dimension_numbers<[1], [0], [0], [1], [0, 0, 1, 1], [], []>} : vector<16x64xf32>, vector<64x128xf32>, vector<16x128xf32> -> vector<16x128xf32>
    %23 = arith.addf %19, %22 : vector<16x128xf32>
    %c2 = arith.constant 2 : index
    %c0_20 = arith.constant 0 : index
    %c0_21 = arith.constant 0 : index
    %24 = vector.load %arg2[%c2, %c0_20, %c0_21] : memref<3x64x128xf32, #tpu.memory_space<vmem>>, vector<1x64x128xf32>
    %25 = vector.shape_cast %24 : vector<1x64x128xf32> to vector<64x128xf32>
    %cst_22 = arith.constant dense<0.000000e+00> : vector<16x128xf32>
    %26 = tpu.matmul %16, %25, %cst_22 {dimension_numbers = #tpu.dot_dimension_numbers<[1], [0], [0], [1], [0, 0, 1, 1], [], []>} : vector<16x64xf32>, vector<64x128xf32>, vector<16x128xf32> -> vector<16x128xf32>
    %27 = arith.addf %23, %26 : vector<16x128xf32>
    %28 = vector.broadcast %8 : vector<1x128xf32> to vector<16x128xf32>
    %29 = arith.mulf %27, %28 : vector<16x128xf32>
    %30 = vector.broadcast %10 : vector<1x128xf32> to vector<16x128xf32>
    %31 = arith.addf %29, %30 : vector<16x128xf32>
    %cst_23 = arith.constant 0.000000e+00 : f32
    %32 = vector.broadcast %cst_23 : f32 to vector<16x128xf32>
    %33 = arith.maximumf %31, %32 : vector<16x128xf32>
    %c2_24 = arith.constant 2 : index
    %c0_25 = arith.constant 0 : index
    %c0_26 = arith.constant 0 : index
    %34 = vector.load %arg4[%c2_24, %c0_25, %c0_26] : memref<4x1x128xf32, #tpu.memory_space<vmem>>, vector<1x1x128xf32>
    %35 = vector.shape_cast %34 : vector<1x1x128xf32> to vector<1x128xf32>
    %c3 = arith.constant 3 : index
    %c0_27 = arith.constant 0 : index
    %c0_28 = arith.constant 0 : index
    %36 = vector.load %arg4[%c3, %c0_27, %c0_28] : memref<4x1x128xf32, #tpu.memory_space<vmem>>, vector<1x1x128xf32>
    %37 = vector.shape_cast %36 : vector<1x1x128xf32> to vector<1x128xf32>
    %c1_i32_29 = arith.constant 1 : i32
    %38 = tpu.dynamic_rotate %33 by %c1_i32_29 dim 0 : vector<16x128xf32>, i32 -> vector<16x128xf32>
    %39 = vector.broadcast %2 : vector<16x1xf32> to vector<16x128xf32>
    %40 = arith.mulf %38, %39 : vector<16x128xf32>
    %c15_i32_30 = arith.constant 15 : i32
    %41 = tpu.dynamic_rotate %33 by %c15_i32_30 dim 0 : vector<16x128xf32>, i32 -> vector<16x128xf32>
    %42 = vector.broadcast %4 : vector<16x1xf32> to vector<16x128xf32>
    %43 = arith.mulf %41, %42 : vector<16x128xf32>
    %c1_31 = arith.constant 1 : index
    %c0_32 = arith.constant 0 : index
    %c0_33 = arith.constant 0 : index
    %44 = vector.load %arg3[%c1_31, %c0_32, %c0_33] : memref<3x128x128xf32, #tpu.memory_space<vmem>>, vector<1x128x128xf32>
    %45 = vector.shape_cast %44 : vector<1x128x128xf32> to vector<128x128xf32>
    %cst_34 = arith.constant dense<0.000000e+00> : vector<16x128xf32>
    %46 = tpu.matmul %33, %45, %cst_34 {dimension_numbers = #tpu.dot_dimension_numbers<[1], [0], [0], [1], [0, 0, 1, 1], [], []>} : vector<16x128xf32>, vector<128x128xf32>, vector<16x128xf32> -> vector<16x128xf32>
    %c0_35 = arith.constant 0 : index
    %c0_36 = arith.constant 0 : index
    %c0_37 = arith.constant 0 : index
    %47 = vector.load %arg3[%c0_35, %c0_36, %c0_37] : memref<3x128x128xf32, #tpu.memory_space<vmem>>, vector<1x128x128xf32>
    %48 = vector.shape_cast %47 : vector<1x128x128xf32> to vector<128x128xf32>
    %cst_38 = arith.constant dense<0.000000e+00> : vector<16x128xf32>
    %49 = tpu.matmul %40, %48, %cst_38 {dimension_numbers = #tpu.dot_dimension_numbers<[1], [0], [0], [1], [0, 0, 1, 1], [], []>} : vector<16x128xf32>, vector<128x128xf32>, vector<16x128xf32> -> vector<16x128xf32>
    %50 = arith.addf %46, %49 : vector<16x128xf32>
    %c2_39 = arith.constant 2 : index
    %c0_40 = arith.constant 0 : index
    %c0_41 = arith.constant 0 : index
    %51 = vector.load %arg3[%c2_39, %c0_40, %c0_41] : memref<3x128x128xf32, #tpu.memory_space<vmem>>, vector<1x128x128xf32>
    %52 = vector.shape_cast %51 : vector<1x128x128xf32> to vector<128x128xf32>
    %cst_42 = arith.constant dense<0.000000e+00> : vector<16x128xf32>
    %53 = tpu.matmul %43, %52, %cst_42 {dimension_numbers = #tpu.dot_dimension_numbers<[1], [0], [0], [1], [0, 0, 1, 1], [], []>} : vector<16x128xf32>, vector<128x128xf32>, vector<16x128xf32> -> vector<16x128xf32>
    %54 = arith.addf %50, %53 : vector<16x128xf32>
    %55 = vector.broadcast %35 : vector<1x128xf32> to vector<16x128xf32>
    %56 = arith.mulf %54, %55 : vector<16x128xf32>
    %57 = vector.broadcast %37 : vector<1x128xf32> to vector<16x128xf32>
    %58 = arith.addf %56, %57 : vector<16x128xf32>
    %c1_i32_43 = arith.constant 1 : i32
    %59 = tpu.dynamic_rotate %58 by %c1_i32_43 dim 0 : vector<16x128xf32>, i32 -> vector<16x128xf32>
    %60 = vector.broadcast %2 : vector<16x1xf32> to vector<16x128xf32>
    %61 = arith.mulf %59, %60 : vector<16x128xf32>
    %cst_44 = arith.constant 1.000000e+00 : f32
    %62 = vector.broadcast %cst_44 : f32 to vector<16x1xf32>
    %63 = arith.subf %2, %62 : vector<16x1xf32>
    %cst_45 = arith.constant 1.000000e+30 : f32
    %64 = vector.broadcast %cst_45 : f32 to vector<16x1xf32>
    %65 = arith.mulf %63, %64 : vector<16x1xf32>
    %66 = vector.broadcast %65 : vector<16x1xf32> to vector<16x128xf32>
    %67 = arith.addf %61, %66 : vector<16x128xf32>
    %68 = arith.maximumf %58, %67 : vector<16x128xf32>
    %c15_i32_46 = arith.constant 15 : i32
    %69 = tpu.dynamic_rotate %58 by %c15_i32_46 dim 0 : vector<16x128xf32>, i32 -> vector<16x128xf32>
    %70 = vector.broadcast %4 : vector<16x1xf32> to vector<16x128xf32>
    %71 = arith.mulf %69, %70 : vector<16x128xf32>
    %cst_47 = arith.constant 1.000000e+00 : f32
    %72 = vector.broadcast %cst_47 : f32 to vector<16x1xf32>
    %73 = arith.subf %4, %72 : vector<16x1xf32>
    %cst_48 = arith.constant 1.000000e+30 : f32
    %74 = vector.broadcast %cst_48 : f32 to vector<16x1xf32>
    %75 = arith.mulf %73, %74 : vector<16x1xf32>
    %76 = vector.broadcast %75 : vector<16x1xf32> to vector<16x128xf32>
    %77 = arith.addf %71, %76 : vector<16x128xf32>
    %78 = arith.maximumf %68, %77 : vector<16x128xf32>
    %c0_49 = arith.constant 0 : index
    %c0_50 = arith.constant 0 : index
    %79 = vector.load %arg7[%c0_49, %c0_50] : memref<8x16xf32, #tpu.memory_space<vmem>>, vector<8x16xf32>
    %cst_51 = arith.constant dense<0.000000e+00> : vector<8x128xf32>
    %80 = tpu.matmul %79, %78, %cst_51 {dimension_numbers = #tpu.dot_dimension_numbers<[1], [0], [0], [1], [0, 0, 1, 1], [], []>} : vector<8x16xf32>, vector<16x128xf32>, vector<8x128xf32> -> vector<8x128xf32>
    %c0_52 = arith.constant 0 : index
    %c0_53 = arith.constant 0 : index
    %c0_54 = arith.constant 0 : index
    %81 = vector.load %arg6[%c0_52, %c0_53, %c0_54] : memref<2x1x128xf32, #tpu.memory_space<vmem>>, vector<1x1x128xf32>
    %82 = vector.shape_cast %81 : vector<1x1x128xf32> to vector<1x128xf32>
    %c1_55 = arith.constant 1 : index
    %c0_56 = arith.constant 0 : index
    %c0_57 = arith.constant 0 : index
    %83 = vector.load %arg6[%c1_55, %c0_56, %c0_57] : memref<2x1x128xf32, #tpu.memory_space<vmem>>, vector<1x1x128xf32>
    %84 = vector.shape_cast %83 : vector<1x1x128xf32> to vector<1x128xf32>
    %c8_i32 = arith.constant 8 : i32
    %85 = tpu.dynamic_rotate %80 by %c8_i32 dim 1 : vector<8x128xf32>, i32 -> vector<8x128xf32>
    %86 = vector.broadcast %82 : vector<1x128xf32> to vector<8x128xf32>
    %87 = arith.mulf %85, %86 : vector<8x128xf32>
    %cst_58 = arith.constant 1.000000e+00 : f32
    %88 = vector.broadcast %cst_58 : f32 to vector<1x128xf32>
    %89 = arith.subf %82, %88 : vector<1x128xf32>
    %cst_59 = arith.constant 1.000000e+30 : f32
    %90 = vector.broadcast %cst_59 : f32 to vector<1x128xf32>
    %91 = arith.mulf %89, %90 : vector<1x128xf32>
    %92 = vector.broadcast %91 : vector<1x128xf32> to vector<8x128xf32>
    %93 = arith.addf %87, %92 : vector<8x128xf32>
    %94 = arith.maximumf %80, %93 : vector<8x128xf32>
    %c120_i32 = arith.constant 120 : i32
    %95 = tpu.dynamic_rotate %80 by %c120_i32 dim 1 : vector<8x128xf32>, i32 -> vector<8x128xf32>
    %96 = vector.broadcast %84 : vector<1x128xf32> to vector<8x128xf32>
    %97 = arith.mulf %95, %96 : vector<8x128xf32>
    %cst_60 = arith.constant 1.000000e+00 : f32
    %98 = vector.broadcast %cst_60 : f32 to vector<1x128xf32>
    %99 = arith.subf %84, %98 : vector<1x128xf32>
    %cst_61 = arith.constant 1.000000e+30 : f32
    %100 = vector.broadcast %cst_61 : f32 to vector<1x128xf32>
    %101 = arith.mulf %99, %100 : vector<1x128xf32>
    %102 = vector.broadcast %101 : vector<1x128xf32> to vector<8x128xf32>
    %103 = arith.addf %97, %102 : vector<8x128xf32>
    %104 = arith.maximumf %94, %103 : vector<8x128xf32>
    %c0_62 = arith.constant 0 : index
    %c0_63 = arith.constant 0 : index
    %105 = vector.load %arg8[%c0_62, %c0_63] : memref<128x64xf32, #tpu.memory_space<vmem>>, vector<128x64xf32>
    %cst_64 = arith.constant dense<0.000000e+00> : vector<8x64xf32>
    %106 = tpu.matmul %104, %105, %cst_64 {dimension_numbers = #tpu.dot_dimension_numbers<[1], [0], [0], [1], [0, 0, 1, 1], [], []>} : vector<8x128xf32>, vector<128x64xf32>, vector<8x64xf32> -> vector<8x64xf32>
    %c0_65 = arith.constant 0 : index
    %c0_66 = arith.constant 0 : index
    %107 = tpu.strided_load %arg1[%c0_65, %c0_66] {strides = array<i32: 2, 1>} : memref<16x64xf32, #tpu.memory_space<vmem>>, vector<8x64xf32>
    %c0_67 = arith.constant 0 : index
    %c0_68 = arith.constant 0 : index
    %108 = vector.load %arg9[%c0_67, %c0_68] : memref<64x64xf32, #tpu.memory_space<vmem>>, vector<64x64xf32>
    %cst_69 = arith.constant dense<0.000000e+00> : vector<8x64xf32>
    %109 = tpu.matmul %107, %108, %cst_69 {dimension_numbers = #tpu.dot_dimension_numbers<[1], [0], [0], [1], [0, 0, 1, 1], [], []>} : vector<8x64xf32>, vector<64x64xf32>, vector<8x64xf32> -> vector<8x64xf32>
    %c0_70 = arith.constant 0 : index
    %c0_71 = arith.constant 0 : index
    %c0_72 = arith.constant 0 : index
    %110 = vector.load %arg10[%c0_70, %c0_71, %c0_72] : memref<2x1x64xf32, #tpu.memory_space<vmem>>, vector<1x1x64xf32>
    %111 = vector.shape_cast %110 : vector<1x1x64xf32> to vector<1x64xf32>
    %112 = vector.broadcast %111 : vector<1x64xf32> to vector<8x64xf32>
    %113 = arith.mulf %109, %112 : vector<8x64xf32>
    %c1_73 = arith.constant 1 : index
    %c0_74 = arith.constant 0 : index
    %c0_75 = arith.constant 0 : index
    %114 = vector.load %arg10[%c1_73, %c0_74, %c0_75] : memref<2x1x64xf32, #tpu.memory_space<vmem>>, vector<1x1x64xf32>
    %115 = vector.shape_cast %114 : vector<1x1x64xf32> to vector<1x64xf32>
    %116 = vector.broadcast %115 : vector<1x64xf32> to vector<8x64xf32>
    %117 = arith.addf %113, %116 : vector<8x64xf32>
    %118 = arith.addf %106, %117 : vector<8x64xf32>
    %c0_76 = arith.constant 0 : index
    %c0_77 = arith.constant 0 : index
    %119 = vector.load %arg11[%c0_76, %c0_77] : memref<8x64xf32, #tpu.memory_space<vmem>>, vector<8x64xf32>
    tpu.vector_store %arg11[%c0_76, %c0_77], %118 {strides = array<i32>} : memref<8x64xf32, #tpu.memory_space<vmem>>, vector<8x64xf32>,
    return
  }
  func.func @transform_0(%arg0: i32) -> (i32, i32) {
    %c0_i32 = arith.constant 0 : i32
    %c0_i32_0 = arith.constant 0 : i32
    return %arg0, %c0_i32 : i32, i32
  }
  func.func @transform_1(%arg0: i32) -> (i32, i32, i32) {
    %c0_i32 = arith.constant 0 : i32
    %c0_i32_0 = arith.constant 0 : i32
    %c0_i32_1 = arith.constant 0 : i32
    %c0_i32_2 = arith.constant 0 : i32
    return %c0_i32, %c0_i32_0, %c0_i32_1 : i32, i32, i32
  }
  func.func @transform_2(%arg0: i32) -> (i32, i32, i32) {
    %c0_i32 = arith.constant 0 : i32
    %c0_i32_0 = arith.constant 0 : i32
    %c0_i32_1 = arith.constant 0 : i32
    %c0_i32_2 = arith.constant 0 : i32
    return %c0_i32, %c0_i32_0, %c0_i32_1 : i32, i32, i32
  }
  func.func @transform_3(%arg0: i32) -> (i32, i32, i32) {
    %c0_i32 = arith.constant 0 : i32
    %c0_i32_0 = arith.constant 0 : i32
    %c0_i32_1 = arith.constant 0 : i32
    %c0_i32_2 = arith.constant 0 : i32
    return %c0_i32, %c0_i32_0, %c0_i32_1 : i32, i32, i32
  }
  func.func @transform_4(%arg0: i32) -> (i32, i32, i32) {
    %c0_i32 = arith.constant 0 : i32
    %c0_i32_0 = arith.constant 0 : i32
    %c0_i32_1 = arith.constant 0 : i32
    %c0_i32_2 = arith.constant 0 : i32
    return %c0_i32, %c0_i32_0, %c0_i32_1 : i32, i32, i32
  }
  func.func @transform_5(%arg0: i32) -> (i32, i32, i32) {
    %c0_i32 = arith.constant 0 : i32
    %c0_i32_0 = arith.constant 0 : i32
    %c0_i32_1 = arith.constant 0 : i32
    %c0_i32_2 = arith.constant 0 : i32
    return %c0_i32, %c0_i32_0, %c0_i32_1 : i32, i32, i32
  }
  func.func @transform_6(%arg0: i32) -> (i32, i32) {
    %c0_i32 = arith.constant 0 : i32
    %c0_i32_0 = arith.constant 0 : i32
    %c0_i32_1 = arith.constant 0 : i32
    return %c0_i32, %c0_i32_0 : i32, i32
  }
  func.func @transform_7(%arg0: i32) -> (i32, i32) {
    %c0_i32 = arith.constant 0 : i32
    %c0_i32_0 = arith.constant 0 : i32
    %c0_i32_1 = arith.constant 0 : i32
    return %c0_i32, %c0_i32_0 : i32, i32
  }
  func.func @transform_8(%arg0: i32) -> (i32, i32) {
    %c0_i32 = arith.constant 0 : i32
    %c0_i32_0 = arith.constant 0 : i32
    %c0_i32_1 = arith.constant 0 : i32
    return %c0_i32, %c0_i32_0 : i32, i32
  }
  func.func @transform_9(%arg0: i32) -> (i32, i32, i32) {
    %c0_i32 = arith.constant 0 : i32
    %c0_i32_0 = arith.constant 0 : i32
    %c0_i32_1 = arith.constant 0 : i32
    %c0_i32_2 = arith.constant 0 : i32
    return %c0_i32, %c0_i32_0, %c0_i32_1 : i32, i32, i32
  }
  func.func @transform_10(%arg0: i32) -> (i32, i32) {
    %c0_i32 = arith.constant 0 : i32
    %c0_i32_0 = arith.constant 0 : i32
    return %arg0, %c0_i32 : i32, i32
  }
}

</mosaic_0001>

<bundles_post_ra>
// kernel: block_forward_packed.1
= control target key start
LH: loop header
LB: loop body
LE: loop exit
PB: predicated region body
PF: predicated region fallthrough
CT: control target
= control target key end

     0   :  { %15 = vsyncpa [#allocation3], 0  ;;  %s2666_s0 = inlined_call_operand.vmem [shape: f32[32,64], index: 0, kind: input, shape index: {}]   ;;  %s2667_s1 = inlined_call_operand.vmem [shape: f32[3,64,128], index: 1, kind: input, shape index: {}]   ;;  %s2668_s2 = inlined_call_operand.hbm [shape: f32[3,128,128], index: 2, kind: input, shape index: {}]   ;;  %s2669_s3 = inlined_call_operand.hbm [shape: f32[4,1,128], index: 3, kind: input, shape index: {}]   ;;  %s2670_s4 = inlined_call_operand.vmem [shape: f32[2,16,1], index: 4, kind: input, shape index: {}]   ;;  %s2671_s5 = inlined_call_operand.vmem [shape: f32[2,1,128], index: 5, kind: input, shape index: {}]   ;;  %s2672_s6 = inlined_call_operand.vmem [shape: f32[8,16], index: 6, kind: input, shape index: {}]   ;;  %s2673_s7 = inlined_call_operand.vmem [shape: f32[128,64], index: 7, kind: input, shape index: {}]   ;;  %s2674_s8 = inlined_call_operand.hbm [shape: f32[64,64], index: 8, kind: input, shape index: {}]   ;;  %s2675_s9 = inlined_call_operand.hbm [shape: f32[2,1,64], index: 9, kind: input, shape index: {}]   ;;  %s2676_s10 = inlined_call_operand.hbm [shape: f32[16,64], index: 10, kind: output, shape index: {}]  }
   0x1   :  { %16 = vsyncpa [#allocation6], 0 }
   0x2   :  { %17 = vsyncpa [#allocation9], 0 }
   0x3   :  { %18 = vsyncpa [#allocation4], 0 }
   0x4   :  { %20 = vsyncpa [#allocation4 + $0x1], 0  ;;  %s2262_s13 = smov 0   ;;  %s2264_s14 = smov 0  }
   0x5   :  { %s2266_s15 = smov 0   ;;  %s2268_s16 = smov 0  }
   0x6 LB: > { %2683 = sst [smem:[#allocation15_spill]] %s2187_s15  ;;  %s2283_s17 = sadd.s32 4294967295, %s2191_s16   ;;  %s2191_s16 = sphi %s2268_s16, %s2704_s16   ;;  %s2187_s15 = sphi %s2266_s15, %s2701_s15   ;;  %s2183_s14 = sphi %s2264_s14, %s2703_s14   ;;  %s2179_s13 = sphi %s2262_s13, %s2702_s13  }
   0x7   : > { %s1530_s18 = sadd.s32 4294967294, %s2191_s16   ;;  %s2287_s19 = sadd.s32 1, %s2191_s16  }
   0x8   : > { %s248_s20 = sadd.s32 1, %s2187_s15  ;;  %s245_s21 = ssub.s32 %s2191_s16, %s2287_s19 }
   0x9   : > { %p258_p0 = scmp.ne.s32.totalorder %s2187_s15, %s2183_s14  ;;  %p246_p1 = scmp.eq.s32.totalorder %s245_s21, 0 }
   0xa   : > { %p259_p2 = scmp.eq.s32.totalorder %s2283_s17, 1  ;;  %p264_p3 = scmp.ne.s32.totalorder %s2183_s14, %s2179_s13 }
   0xb   : > { %p265_p4 = scmp.eq.s32.totalorder %s1530_s18, 1  ;;  %p1531_p7 = scmp.ge.s32.totalorder %s2191_s16, 1 }
   0xc   : > { %s2298_s22 = scalar_select %p246_p1, %s2187_s15, %s248_s20  }
   0xd   : > { %p2300_p5 = por %p259_p2, %p258_p0  ;;  %p2304_p6 = por %p265_p4, %p264_p3 }
   0xe   : > { %2684 = sst [smem:[#allocation16_spill]] %s2298_s22  ;;  %p272_p8 = scmp.lt.s32.totalorder %s2191_s16, 3 }
   0xf   : > { %s2685_s23 = scalar_select %p2300_p5, 1, 0 }
  0x10   : > { %s2686_s24 = scalar_select %p2304_p6, 1, 0 }
  0x11   : > { %p2680_p9 = scmp.eq.s32.totalorder %s2283_s17, 0  ;;  %p2311_p10 = pnand %p1531_p7, %p272_p8 }
  0x12   : > { %s2193_s26 = smov [#allocation5]   ;;  %s2194_s29 = smov [#allocation2]  }
  0x13   : > { %s2687_s25 = scalar_select %p2311_p10, 1, 0 }
  0x14   : > { %s300_s27 = sshll.u32 %s2193_s26, 4  ;;  %p1942_p11 = pneg %p2311_p10  ;;  %s301_s27 = int_to_ptr.vmem [resolvable:$true] %s300_s27 }
  0x15   : > { %s287_s30 = sshll.u32 %s2194_s29, 4  ;;  %s2026_s11 = scalar_lea.vmem %s301_s27, 64  ;;  %s288_s30 = int_to_ptr.vmem [resolvable:$true] %s287_s30 }
  0x16   : > { %p2319_p12 = pnand %p2680_p9, %p1942_p11  ;;  %p2027_p0 = scmp.ne.s32.totalorder %s301_s27, %s2026_s11 }
  0x17   : > { %p2034_p3 = scmp.lt.s32.totalorder %s301_s27, %s301_s27  ;;  %p2035_p4 = scmp.lt.s32.totalorder %s2026_s11, %s2026_s11 }
  0x18   : > { %p2017_p13 = pneg %p2319_p12 }
  0x19   : > { %p2036_p7 = por %p2035_p4, %p2034_p3 }
  0x1a   : > { %p2029_p1 = pnand %p2027_p0, %p2017_p13 }
  0x1c   : > { %p2030_p2 = pneg %p2029_p1 }
  0x1e   : > { %p2037_p8 = pnand %p2036_p7, %p2030_p2 }
  0x20   : > { %2040 = shalt.err (!%p2037_p8)
}
  0x21   : > { %s2678_s12 = smov 16   ;;  %s2679_s18 = smov 1  }
  0x22   : > { %1948 = dma.hbm_to_vmem [thread:$0]  (!%p2319_p12), %s2669_s3, 64, %s301_s27, [#allocation6], %s2678_s12, %s2678_s12, %s2679_s18  }
  0x23   : > { %s2052_s26 = scalar_lea.vmem %s288_s30, 6144  ;;  %p2060_p2 = scmp.lt.s32.totalorder %s288_s30, %s288_s30 }
  0x24   : > { %p2053_p11 = scmp.ne.s32.totalorder %s288_s30, %s2052_s26  ;;  %p2061_p3 = scmp.lt.s32.totalorder %s2052_s26, %s2052_s26 }
  0x26   : > { %p2055_p0 = pnand %p2053_p11, %p2017_p13  ;;  %p2062_p4 = por %p2061_p3, %p2060_p2 }
  0x28   : > { %p2056_p1 = pneg %p2055_p0 }
  0x2a   : > { %p2063_p7 = pnand %p2062_p4, %p2056_p1 }
  0x2c   : > { %2066 = shalt.err (!%p2063_p7)
}
  0x2d   : > { %s2197_s29 = smov 128   ;;  %s2198_s11 = smov 8  }
  0x2e   : > { %1945 = dma.hbm_to_vmem [thread:$0]  (!%p2319_p12), %s2668_s2, 6144, %s288_s30, [#allocation3], %s2197_s29, %s2197_s29, %s2198_s11  }
  0x2f   : > { %s2199_s27 = smov [#allocation7]   ;;  %s2200_s21 = smov [#allocation8]  }
  0x30   : > { %s325_s20 = sshll.u32 %s2199_s27, 4  ;;  %s338_s12 = sshll.u32 %s2200_s21, 4  ;;  %s326_s20 = int_to_ptr.vmem [resolvable:$true] %s325_s20  ;;  %s339_s12 = int_to_ptr.vmem [resolvable:$true] %s338_s12 }
  0x31   : > { %s2078_s18 = scalar_lea.vmem %s326_s20, 1024  ;;  %p2086_p1 = scmp.lt.s32.totalorder %s326_s20, %s326_s20 }
  0x32   : > { %p2079_p8 = scmp.ne.s32.totalorder %s326_s20, %s2078_s18  ;;  %p2087_p2 = scmp.lt.s32.totalorder %s2078_s18, %s2078_s18 }
  0x34   : > { %p2081_p11 = pnand %p2079_p8, %p2017_p13  ;;  %p2088_p3 = por %p2087_p2, %p2086_p1 }
  0x36   : > { %p2082_p0 = pneg %p2081_p11 }
  0x38   : > { %p2089_p4 = pnand %p2088_p3, %p2082_p0 }
  0x3a   : > { %2092 = shalt.err (!%p2089_p4)
}
  0x3b   : > { %1951 = dma.hbm_to_vmem [thread:$0]  (!%p2319_p12), %s2674_s8, 1024, %s326_s20, [#allocation6], %s2197_s29, %s2197_s29, %s2198_s11  }
  0x3c   : > { %s2104_s30 = scalar_lea.vmem %s339_s12, 32  ;;  %p2112_p8 = scmp.lt.s32.totalorder %s339_s12, %s339_s12 }
  0x3d   : > { %p2105_p7 = scmp.ne.s32.totalorder %s339_s12, %s2104_s30  ;;  %p2113_p11 = scmp.lt.s32.totalorder %s2104_s30, %s2104_s30 }
  0x3f   : > { %p2107_p9 = pnand %p2105_p7, %p2017_p13  ;;  %p2114_p5 = por %p2113_p11, %p2112_p8 }
  0x41   : > { %p2108_p6 = pneg %p2107_p9 }
  0x43   : > { %p2115_p10 = pnand %p2114_p5, %p2108_p6 }
  0x45   : > { %2118 = shalt.err (!%p2115_p10)
}
  0x46   : > { %s2689_s18 = smov 1   ;;  %s2690_s26 = smov 16  }
  0x47   : > { %1954 = dma.hbm_to_vmem [thread:$0]  (!%p2319_p12), %s2675_s9, 32, %s339_s12, [#allocation9], %s2690_s26, %s2690_s26, %s2689_s18  }
  0x48   : > { %p2691_p0 = scmp.ne.s32.totalorder %s2687_s25, 0 }
  0x49   : > { %p2692_p13 = scmp.eq.s32.totalorder (!%p2691_p0), %s2283_s17, 0 }
  0x4a   : > { %363 = sbr.rel (%p2691_p0) target bundleno = 1231 (0x4cf), region = 60 }
  0x4f   : > { %2162 = dma.done.wait (%p2692_p13), [#allocation3], 6144   ;;  %p2693_p9 = pmov %p2692_p13 }
  0x51   : > { %2164 = vsyncadd (%p2693_p9), [#allocation3], 4294961152  ;;  %p2694_p5 = pmov %p2693_p9 }
  0x53   : > { %2166 = dma.done.wait (%p2694_p5), [#allocation6], 1088   ;;  %p2695_p6 = pmov %p2694_p5 }
  0x54   : > { %p2696_p10 = pmov %p2694_p5 }
  0x55   : > { %2168 = vsyncadd (%p2695_p6), [#allocation6], 4294966208 }
  0x56   : > { %2170 = dma.done.wait (%p2696_p10), [#allocation9], 32   ;;  %p2697_p12 = pmov %p2694_p5 }
  0x57   : > { %v2201_v0 = vmov 0   ;;  %v421_v1 = vld [vmem:[%s2670_s4] sm:$0xff]  ;;  %v422_v2 = vld [vmem:[%s2670_s4 + $0x8] sm:$0xff]  ;;  %v1545_v4 = vld [vmem:[%s2670_s4 + $0x10] sm:$0xff]  ;;  %s1543_s25 = sshll.u32 %s2283_s17, 1  ;;  %v433_v24 = vlaneseq  ;;  %vm484_vm1 = vcmask 523264  }
  0x58   : > { %2172 = vsyncadd (%p2697_p12), [#allocation9], 4294967264  ;;  %2013 = vset.pattern.permute.xlu0 %v2201_v0  ;;  %2014 = vset.pattern.permute.xlu1 %v2201_v0  ;;  %v1574_v3 = vadd.f32 -1.0, %v422_v2  ;;  %v483_v5 = vld [vmem:[%s2667_s1 + $0x38] sm:$0xff]  ;;  %v482_v6 = vld [vmem:[%s2667_s1 + $0x30] sm:$0xff]  ;;  %v1573_v7 = vadd.f32 -1.0, %v421_v1 }
  0x59   : > { %440 = vperm.xlu0 %2013, %v421_v1   ;;  %v1546_v8 = vld [vmem:[%s2670_s4 + $0x18] sm:$0xff]  ;;  %457 = vperm.xlu1 %2014, %v1545_v4   ;;  %v481_v9 = vld [vmem:[%s2667_s1 + $0x28] sm:$0xff]  ;;  %v480_v12 = vld [vmem:[%s2667_s1 + $0x20] sm:$0xff]  ;;  %v1575_v14 = vadd.f32 -1.0, %v1545_v4  ;;  %p414_p1 = scmp.lt.s32.totalorder %s1543_s25, 3  ;;  %v2428_v27 = vshrl.u32 %v433_v24, 7 }
  0x5a   : > { %1701 = vmatprep.subr.mxu0 %v483_v5  ;;  %v1075_v10 = vmul.f32 1e+30, %v1574_v3  ;;  %v1576_v11 = vadd.f32 -1.0, %v1546_v8  ;;  %v1074_v13 = vmul.f32 1e+30, %v1573_v7  ;;  %v479_v15 = vld [vmem:[%s2667_s1 + $0x18] sm:$0xff] }
  0x5b   : > { %1702 = vmatpush3.msra.mxu0 %v483_v5  ;;  %v478_v17 = vld [vmem:[%s2667_s1 + $0x10] sm:$0xff]  ;;  %v1098_v18 = vmul.f32 1e+30, %v1575_v14  ;;  %v477_v19 = vld [vmem:[%s2667_s1 + $0x8] sm:$0xff]  ;;  %v476_v20 = vld [vmem:[%s2667_s1] sm:$0xff]  ;;  %s2706_s25 = smov (!%p414_p1, %s1543_s25), 3 }
  0x5c   : > { %1703 = vmatprep.subr.mxu0 %v482_v6  ;;  %v1099_v16 = vmul.f32 1e+30, %v1576_v11  ;;  %v1554_v21 = vld [vmem:[%s2667_s1 + $0x78] sm:$0xff]  ;;  %s1544_s28 = sshll.u32 %s2706_s25, 3  ;;  %vm435_vm0 = vcmp.lt.s32.totalorder %v2428_v27, 1  ;;  %v1553_v36 = vld [vmem:[%s2667_s1 + $0x70] sm:$0xff] }
  0x5d   : > { %445 = vperm.xlu0 %2013, %v422_v2   ;;  %1704 = vmatpush3.msra.mxu0 %v482_v6  ;;  %s2420_s11 = scalar_lea.vmem %s2666_s0, %s1544_s28  ;;  %v1552_v37 = vld [vmem:[%s2667_s1 + $0x68] sm:$0xff]  ;;  %v1551_v38 = vld [vmem:[%s2667_s1 + $0x60] sm:$0xff]  ;;  %v1550_v39 = vld [vmem:[%s2667_s1 + $0x58] sm:$0xff]  ;;  %vm452_vm2 = vcmp.lt.s32.totalorder %v2428_v27, 7  ;;  %vm2203_vm3 = vmmov 0   ;;  %vm1115_vm4 = vcmask 130048  }
  0x5e   : > { %462 = vperm.xlu1 %2014, %v1546_v8   ;;  %1705 = vmatprep.subr.mxu0 %v481_v9  ;;  %v419_v22 = vld [vmem:[%s2420_s11] sm:$0xff]  ;;  %v420_v23 = vld [vmem:[%s2420_s11 + $0x8] sm:$0xff]  ;;  %v1549_v42 = vld [vmem:[%s2667_s1 + $0x50] sm:$0xff]  ;;  %s2204_s30 = smov 8   ;;  %s2205_s18 = smov 120  }
  0x5f   : > { %1706 = vmatpush3.msra.mxu0 %v481_v9  ;;  %v2424_v25 = vmax.f32 %v419_v22, 0.0  ;;  %v2426_v26 = vmax.f32 %v420_v23, 0.0  ;;  %v1548_v43 = vld [vmem:[%s2667_s1 + $0x48] sm:$0xff]  ;;  %v1547_v45 = vld [vmem:[%s2667_s1 + $0x40] sm:$0xff]  ;;  %v1566_v48 = vld [vmem:[%s2667_s1 + $0xb8] sm:$0xff]  ;;  %s410_s28 = sand.u32 1, %s2183_s14  }
  0x60   : > { %1707 = vmatprep.subr.mxu0 %v480_v12  ;;  %v1565_v49 = vld [vmem:[%s2667_s1 + $0xb0] sm:$0xff]  ;;  %v1564_v50 = vld [vmem:[%s2667_s1 + $0xa8] sm:$0xff]  ;;  %v1563_v51 = vld [vmem:[%s2667_s1 + $0xa0] sm:$0xff]  ;;  %s1542_s12 = sshll.u32 %s410_s28, 3  ;;  %s1585_s29 = sshll.u32 %s2283_s17, 7 }
  0x61   : > { %1083 = vperm.xlu0 %2013, %v1075_v10   ;;  %1708 = vmatpush3.msra.mxu0 %v480_v12  ;;  %v431_v28 = vrot.slane %v2424_v25, 7  ;;  %v432_v29 = vrot.slane %v2426_v26, 7  ;;  %v450_v40 = vrot.slane %v2424_v25, 1  ;;  %v451_v41 = vrot.slane %v2426_v26, 1  ;;  %v1562_v52 = vld [vmem:[%s2667_s1 + $0x98] sm:$0xff]  ;;  %v1561_v53 = vld [vmem:[%s2667_s1 + $0x90] sm:$0xff] }
  0x62   : > { %1078 = vperm.xlu1 %2014, %v1074_v13   ;;  %1709 = vmatprep.subr.mxu0 %v479_v15  ;;  %v1560_v54 = vld [vmem:[%s2667_s1 + $0x88] sm:$0xff]  ;;  %v1559_v56 = vld [vmem:[%s2667_s1 + $0x80] sm:$0xff]  ;;  %v789_v59 = vld [vmem:[#allocation2 + $0xf8] sm:$0xff]  ;;  %s412_s20 = scalar_lea.vmem [#allocation10], %s1542_s12  ;;  %p2698_p3 = scmp.ne.s32.totalorder %s2685_s23, 0 }
  0x63   : > { %1710 = vmatpush3.msra.mxu0 %v479_v15  ;;  %v437_v30 = vsel %vm435_vm0, %v432_v29, %v431_v28  ;;  %v436_v33 = vsel %vm435_vm0, %v431_v28, %v432_v29  ;;  %v453_v44 = vsel %vm452_vm2, %v450_v40, %v451_v41  ;;  %v454_v55 = vsel %vm452_vm2, %v451_v41, %v450_v40  ;;  %v788_v60 = vld [vmem:[#allocation2 + $0xf0] sm:$0xff]  ;;  %v805_v61 = vld [vmem:[#allocation2 + $0x78] sm:$0xff]  ;;  %v787_v62 = vld [vmem:[#allocation2 + $0xe8] sm:$0xff]  ;;  %s1430_s15 = sshll.u32 %s412_s20, 4  ;;  %s2206_s17 = smov [#allocation10]   ;;  %s1431_s15 = int_to_ptr.vmem [resolvable:$true] %s1430_s15 }
  0x64   : > { %1711 = vmatprep.subr.mxu0 %v478_v17  ;;  %1758 = vmatprep.subr.mxu1 %v805_v61  ;;  %v804_v63 = vld [vmem:[#allocation2 + $0x70] sm:$0xff]  ;;  %v786_v0 = vld [vmem:[#allocation2 + $0xe0] sm:$0xff]  ;;  %v803_v1 = vld [vmem:[#allocation2 + $0x68] sm:$0xff]  ;;  %s2119_s26 = scalar_lea.vmem %s1431_s15, 128  ;;  %s2123_s27 = sshll.u32 %s2206_s17, 4  ;;  %s2124_s27 = int_to_ptr.vmem [resolvable:$false] %s2123_s27 }
  0x65   : > { %1107 = vperm.xlu0 %2013, %v1099_v16   ;;  %1712 = vmatpush3.msra.mxu0 %v478_v17  ;;  %v785_v2 = vld [vmem:[#allocation2 + $0xd8] sm:$0xff]  ;;  %v802_v3 = vld [vmem:[#allocation2 + $0x60] sm:$0xff]  ;;  %v784_v4 = vld [vmem:[#allocation2 + $0xd0] sm:$0xff]  ;;  %p2120_p2 = scmp.ne.s32.totalorder %s1431_s15, %s2119_s26  ;;  %s2125_s21 = scalar_lea.vmem %s2124_s27, 256 }
  0x66   : > { %1102 = vperm.xlu1 %2014, %v1098_v18   ;;  %1713 = vmatprep.subr.mxu0 %v477_v19  ;;  %v801_v5 = vld [vmem:[#allocation2 + $0x58] sm:$0xff]  ;;  %v783_v6 = vld [vmem:[#allocation2 + $0xc8] sm:$0xff]  ;;  %v800_v7 = vld [vmem:[#allocation2 + $0x50] sm:$0xff]  ;;  %p2126_p8 = scmp.lt.s32.totalorder %s1431_s15, %s2124_s27  ;;  %p2127_p11 = scmp.lt.s32.totalorder %s2125_s21, %s2119_s26 }
  0x67   : > { %1714 = vmatpush3.msra.mxu0 %v477_v19  ;;  %1759 = vmatpush3.msra.mxu1 %v805_v61  ;;  %v782_v8 = vld [vmem:[#allocation2 + $0xc0] sm:$0xff]  ;;  %v799_v9 = vld [vmem:[#allocation2 + $0x48] sm:$0xff]  ;;  %v781_v10 = vld [vmem:[#allocation2 + $0xb8] sm:$0xff]  ;;  %p2121_p4 = pnand %p2120_p2, %p2698_p3 }
  0x68   : > { %1715 = vmatprep.subr.mxu0 %v476_v20  ;;  %1760 = vmatprep.subr.mxu1 %v804_v63  ;;  %v798_v11 = vld [vmem:[#allocation2 + $0x40] sm:$0xff]  ;;  %v780_v12 = vld [vmem:[#allocation2 + $0xb0] sm:$0xff]  ;;  %v797_v13 = vld [vmem:[#allocation2 + $0x38] sm:$0xff]  ;;  %p2128_p0 = por %p2127_p11, %p2126_p8 }
  0x69   : > { %1716 = vmatpush3.msra.mxu0 %v476_v20  ;;  %1761 = vmatpush3.msra.mxu1 %v804_v63  ;;  %v779_v14 = vld [vmem:[#allocation2 + $0xa8] sm:$0xff]  ;;  %v796_v15 = vld [vmem:[#allocation2 + $0x30] sm:$0xff]  ;;  %v778_v16 = vld [vmem:[#allocation2 + $0xa0] sm:$0xff]  ;;  %p2122_p7 = pneg %p2121_p4 }
  0x6a   : > { %1720 = vmatprep.subr.mxu0 %v1554_v21  ;;  %1762 = vmatprep.subr.mxu1 %v803_v1  ;;  %v795_v17 = vld [vmem:[#allocation2 + $0x28] sm:$0xff]  ;;  %v777_v18 = vld [vmem:[#allocation2 + $0x98] sm:$0xff]  ;;  %v794_v19 = vld [vmem:[#allocation2 + $0x20] sm:$0xff] }
  0x6b   : > { %1763 = vmatpush3.msra.mxu1 %v803_v1  ;;  %v776_v20 = vld [vmem:[#allocation2 + $0x90] sm:$0xff]  ;;  %v775_v22 = vld [vmem:[#allocation2 + $0x88] sm:$0xff]  ;;  %v774_v24 = vld [vmem:[#allocation2 + $0x80] sm:$0xff]  ;;  %p2129_p13 = pnand %p2128_p0, %p2122_p7 }
  0x6c   : > { %1764 = vmatprep.subr.mxu1 %v802_v3  ;;  %v792_v23 = vld [vmem:[#allocation2 + $0x10] sm:$0xff]  ;;  %v972_v28 = vld [vmem:[#allocation2 + $0x178] sm:$0xff]  ;;  %v1570_v40 = vld [vmem:[#allocation5 + $0x1] ss:$0 sm:$0xff] }
  0x6d   : > { %1765 = vmatpush3.msra.mxu1 %v802_v3  ;;  %v969_v63 = vld [vmem:[#allocation2 + $0x160] sm:$0xff]  ;;  %v967_v1 = vld [vmem:[#allocation2 + $0x150] sm:$0xff] }
  0x6e   : > { %1766 = vmatprep.subr.mxu1 %v801_v5  ;;  %v965_v3 = vld [vmem:[#allocation2 + $0x140] sm:$0xff] }
  0x6f   : > { %1767 = vmatpush3.msra.mxu1 %v801_v5  ;;  %v963_v5 = vld [vmem:[#allocation2 + $0x130] sm:$0xff] }
  0x70   : > { %1768 = vmatprep.subr.mxu1 %v800_v7 }
  0x71   : > { %1769 = vmatpush3.msra.mxu1 %v800_v7  ;;  %v961_v7 = vld [vmem:[#allocation2 + $0x120] sm:$0xff] }
  0x72   : > { %1770 = vmatprep.subr.mxu1 %v799_v9 }
  0x73   : > { %1771 = vmatpush3.msra.mxu1 %v799_v9  ;;  %v959_v9 = vld [vmem:[#allocation2 + $0x110] sm:$0xff] }
  0x74   : > { %1772 = vmatprep.subr.mxu1 %v798_v11 }
  0x75   : > { %1773 = vmatpush3.msra.mxu1 %v798_v11  ;;  %v957_v11 = vld [vmem:[#allocation2 + $0x100] sm:$0xff] }
  0x76   : > { %1774 = vmatprep.subr.mxu1 %v797_v13 }
  0x77   : > { %1775 = vmatpush3.msra.mxu1 %v797_v13 }
  0x78   : > { %1776 = vmatprep.subr.mxu1 %v796_v15 }
  0x79   : > { %1777 = vmatpush3.msra.mxu1 %v796_v15 }
  0x7a   : > { %1778 = vmatprep.subr.mxu1 %v795_v17 }
  0x7b   : > { %1779 = vmatpush3.msra.mxu1 %v795_v17 }
  0x7c   : > { %1780 = vmatprep.subr.mxu1 %v794_v19 }
  0x7d   : > { %1781 = vmatpush3.msra.mxu1 %v794_v19 }
  0xd4   : > { %v2435_v31 = vpop.permute.xlu0 %440  ;;  %v2473_v46 = vpop.permute.xlu1 %457 }
  0xd5   : > { %v448_v32 = vmul.f32 %v2435_v31, %v437_v30  ;;  %v465_v47 = vmul.f32 %v2473_v46, %v453_v44 }
  0xd7   : > { %1717 = vmatprep.mubr.msk.f32.mxu0 %vm484_vm1, %v448_v32 }
  0xd8   : > { %v2441_v34 = vpop.permute.xlu0 %445 }
  0xd9   : > { %v449_v35 = vmul.f32 %v2441_v34, %v436_v33  ;;  %v2505_v57 = vpop.permute.xlu1 %462 }
  0xda   : > { %v466_v58 = vmul.f32 %v2505_v57, %v454_v55 }
  0xdb   : > { %1718 = vmatmul.mubr.msk.f32.vlgmr.msra.gmra.mxu0 %vm484_vm1, %v449_v35 }
  0xdc   : > { %1721 = vmatpush3.msra.mxu0 %v1554_v21  ;;  %1736 = vmatprep.mubr.msk.f32.mxu0 %vm484_vm1, %v2424_v25  ;;  %v793_v21 = vld [vmem:[#allocation2 + $0x18] sm:$0xff]  ;;  %v791_v25 = vld [vmem:[#allocation2 + $0x8] sm:$0xff] }
  0xdd   : > { %1722 = vmatprep.subr.mxu0 %v1553_v36  ;;  %1782 = vmatprep.subr.mxu1 %v793_v21 }
  0xde   : > { %1723 = vmatpush3.msra.mxu0 %v1553_v36  ;;  %1783 = vmatpush3.msra.mxu1 %v793_v21  ;;  %v1569_v36 = vld [vmem:[#allocation5] ss:$0 sm:$0xff] }
  0xdf   : > { %1724 = vmatprep.subr.mxu0 %v1552_v37  ;;  %1784 = vmatprep.subr.mxu1 %v792_v23 }
  0xe0   : > { %1725 = vmatpush3.msra.mxu0 %v1552_v37  ;;  %1785 = vmatpush3.msra.mxu1 %v792_v23 }
  0xe1   : > { %1726 = vmatprep.subr.mxu0 %v1551_v38  ;;  %1786 = vmatprep.subr.mxu1 %v791_v25 }
  0xe2   : > { %1727 = vmatpush3.msra.mxu0 %v1551_v38  ;;  %1787 = vmatpush3.msra.mxu1 %v791_v25 }
  0xe3   : > { %1728 = vmatprep.subr.mxu0 %v1550_v39 }
  0xe4   : > { %1729 = vmatpush3.msra.mxu0 %v1550_v39 }
  0xe5   : > { %1730 = vmatprep.subr.mxu0 %v1549_v42 }
  0xe6   : > { %1731 = vmatpush3.msra.mxu0 %v1549_v42 }
  0xe7   : > { %1732 = vmatprep.subr.mxu0 %v1548_v43 }
  0xe8   : > { %1733 = vmatpush3.msra.mxu0 %v1548_v43 }
  0xe9   : > { %1734 = vmatprep.subr.mxu0 %v1547_v45 }
  0xea   : > { %1735 = vmatpush3.msra.mxu0 %v1547_v45 }
  0xeb   : > { %1737 = vmatmul.mubr.msk.f32.vlgmr.msra.gmra.mxu0 %vm484_vm1, %v2426_v26  ;;  %1739 = vmatprep.subr.mxu0 %v1566_v48  ;;  %v790_v26 = vld [vmem:[#allocation2] sm:$0xff] }
  0xec   : > { %1740 = vmatpush3.msra.mxu0 %v1566_v48  ;;  %1755 = vmatprep.mubr.msk.f32.mxu0 %vm484_vm1, %v465_v47 }
  0xed   : > { %1741 = vmatprep.subr.mxu0 %v1565_v49  ;;  %1788 = vmatprep.subr.mxu1 %v790_v26 }
  0xee   : > { %1742 = vmatpush3.msra.mxu0 %v1565_v49  ;;  %1789 = vmatpush3.msra.mxu1 %v790_v26 }
  0xef   : > { %1743 = vmatprep.subr.mxu0 %v1564_v50  ;;  %1828 = vmatprep.subr.mxu1 %v972_v28 }
  0xf0   : > { %1744 = vmatpush3.msra.mxu0 %v1564_v50 }
  0xf1   : > { %1745 = vmatprep.subr.mxu0 %v1563_v51 }
  0xf2   : > { %1746 = vmatpush3.msra.mxu0 %v1563_v51 }
  0xf3   : > { %1747 = vmatprep.subr.mxu0 %v1562_v52 }
  0xf4   : > { %1748 = vmatpush3.msra.mxu0 %v1562_v52 }
  0xf5   : > { %1749 = vmatprep.subr.mxu0 %v1561_v53 }
  0xf6   : > { %1750 = vmatpush3.msra.mxu0 %v1561_v53 }
  0xf7   : > { %1751 = vmatprep.subr.mxu0 %v1560_v54 }
  0xf8   : > { %1752 = vmatpush3.msra.mxu0 %v1560_v54 }
  0xf9   : > { %1753 = vmatprep.subr.mxu0 %v1559_v56 }
  0xfa   : > { %1754 = vmatpush3.msra.mxu0 %v1559_v56 }
  0xfb   : > { %1756 = vmatmul.mubr.msk.f32.vlgmr.msra.gmra.mxu0 %vm484_vm1, %v466_v58  ;;  %1793 = vmatprep.subr.mxu0 %v789_v59 }
  0xfc   : > { %1794 = vmatpush3.msra.mxu0 %v789_v59 }
  0xfd   : > { %1795 = vmatprep.subr.mxu0 %v788_v60 }
  0xfe   : > { %1796 = vmatpush3.msra.mxu0 %v788_v60  ;;  %v971_v60 = vld [vmem:[#allocation2 + $0x170] sm:$0xff] }
  0xff   : > { %1797 = vmatprep.subr.mxu0 %v787_v62 }
 0x100   : > { %1798 = vmatpush3.msra.mxu0 %v787_v62  ;;  %v970_v62 = vld [vmem:[#allocation2 + $0x168] sm:$0xff] }
 0x101   : > { %1799 = vmatprep.subr.mxu0 %v786_v0 }
 0x102   : > { %1800 = vmatpush3.msra.mxu0 %v786_v0  ;;  %v968_v0 = vld [vmem:[#allocation2 + $0x158] sm:$0xff] }
 0x103   : > { %1801 = vmatprep.subr.mxu0 %v785_v2 }
 0x104   : > { %1802 = vmatpush3.msra.mxu0 %v785_v2  ;;  %v966_v2 = vld [vmem:[#allocation2 + $0x148] sm:$0xff] }
 0x105   : > { %1803 = vmatprep.subr.mxu0 %v784_v4 }
 0x106   : > { %1804 = vmatpush3.msra.mxu0 %v784_v4  ;;  %v964_v4 = vld [vmem:[#allocation2 + $0x138] sm:$0xff] }
 0x107   : > { %1805 = vmatprep.subr.mxu0 %v783_v6 }
 0x108   : > { %1806 = vmatpush3.msra.mxu0 %v783_v6  ;;  %v962_v6 = vld [vmem:[#allocation2 + $0x128] sm:$0xff] }
 0x109   : > { %1807 = vmatprep.subr.mxu0 %v782_v8 }
 0x10a   : > { %1808 = vmatpush3.msra.mxu0 %v782_v8  ;;  %v960_v8 = vld [vmem:[#allocation2 + $0x118] sm:$0xff] }
 0x10b   : > { %1809 = vmatprep.subr.mxu0 %v781_v10 }
 0x10c   : > { %1810 = vmatpush3.msra.mxu0 %v781_v10  ;;  %v958_v10 = vld [vmem:[#allocation2 + $0x108] sm:$0xff] }
 0x10d   : > { %1811 = vmatprep.subr.mxu0 %v780_v12 }
 0x10e   : > { %1812 = vmatpush3.msra.mxu0 %v780_v12 }
 0x10f   : > { %1813 = vmatprep.subr.mxu0 %v779_v14 }
 0x110   : > { %1814 = vmatpush3.msra.mxu0 %v779_v14  ;;  %v2202_v14 = vmov 0.0  }
 0x111   : > { %1815 = vmatprep.subr.mxu0 %v778_v16 }
 0x112   : > { %1816 = vmatpush3.msra.mxu0 %v778_v16 }
 0x113   : > { %1817 = vmatprep.subr.mxu0 %v777_v18 }
 0x114   : > { %1818 = vmatpush3.msra.mxu0 %v777_v18 }
 0x115   : > { %1819 = vmatprep.subr.mxu0 %v776_v20 }
 0x116   : > { %1820 = vmatpush3.msra.mxu0 %v776_v20  ;;  %v1571_v20 = vld [vmem:[#allocation5 + $0x2] ss:$0 sm:$0xff] }
 0x117   : > { %1821 = vmatprep.subr.mxu0 %v775_v22 }
 0x118   : > { %1822 = vmatpush3.msra.mxu0 %v775_v22 }
 0x119   : > { %1823 = vmatprep.subr.mxu0 %v774_v24 }
 0x11a   : > { %1824 = vmatpush3.msra.mxu0 %v774_v24  ;;  %v1572_v24 = vld [vmem:[#allocation5 + $0x3] ss:$0 sm:$0xff] }
 0x11b   : > { %1863 = vmatprep.subr.mxu0 %v2202_v14 }
 0x19b   : > { %v1719_v29 = vpop.f32.mrf.mxu0 }
 0x19d   : > { %v557_v30 = vpop.f32.mrf.mxu0 }
 0x1ab   : > { %v1738_v32 = vpop.f32.mrf.mxu0 }
 0x1ac   : > { %v644_v35 = vadd.f32 %v1738_v32, %v1719_v29 }
 0x1ad   : > { %v638_v33 = vpop.f32.mrf.mxu0 }
 0x1ae   : > { %v639_v38 = vadd.f32 %v638_v33, %v557_v30  ;;  %v1084_v33 = vpop.permute.xlu0 %1083 }
 0x1bb   : > { %v1757_v37 = vpop.f32.mrf.mxu0 }
 0x1bc   : > { %v738_v39 = vadd.f32 %v1757_v37, %v644_v35 }
 0x1bd   : > { %v728_v41 = vpop.f32.mrf.mxu0 }
 0x1be   : > { %v746_v42 = vmul.f32 %v1569_v36, %v738_v39  ;;  %v737_v43 = vadd.f32 %v728_v41, %v639_v38  ;;  %v1079_v39 = vpop.permute.xlu1 %1078 }
 0x1c0   : > { %v754_v44 = vadd.f32 %v1570_v40, %v746_v42  ;;  %v745_v45 = vmul.f32 %v1569_v36, %v737_v43 }
 0x1c2   : > { %v756_v47 = vmax.f32 %v754_v44, 0.0  ;;  %v753_v48 = vadd.f32 %v1570_v40, %v745_v45 }
 0x1c4   : > { %v755_v49 = vmax.f32 %v753_v48, 0.0  ;;  %v762_v52 = vrot.slane %v756_v47, 7  ;;  %v768_v53 = vrot.slane %v756_v47, 1 }
 0x1c6   : > { %v767_v50 = vrot.slane %v755_v49, 1  ;;  %1825 = vmatprep.mubr.f32.mxu0 %v755_v49  ;;  %v761_v51 = vrot.slane %v755_v49, 7 }
 0x1c7   : > { %1826 = vmatmul.mubr.f32.vlgmr.msra.gmra.mxu0 %v756_v47 }
 0x1c8   : > { %v764_v54 = vsel %vm435_vm0, %v762_v52, %v761_v51  ;;  %v763_v55 = vsel %vm435_vm0, %v761_v51, %v762_v52  ;;  %v769_v56 = vsel %vm452_vm2, %v767_v50, %v768_v53  ;;  %v770_v12 = vsel %vm452_vm2, %v768_v53, %v767_v50  ;;  %1867 = vmatprep.mubr.msk.f32.mxu0 %vm2203_vm3, %v2202_v14  ;;  %v1108_v51 = vpop.permute.xlu0 %1107 }
 0x1c9   : > { %v765_v58 = vmul.f32 %v764_v54, %v2435_v31  ;;  %v766_v59 = vmul.f32 %v763_v55, %v2441_v34  ;;  %v771_v61 = vmul.f32 %v769_v56, %v2473_v46  ;;  %v772_v13 = vmul.f32 %v770_v12, %v2505_v57  ;;  %v1103_v55 = vpop.permute.xlu1 %1102  ;;  %v1233_v12 = vld [vmem:[%s2673_s7 + $0x18] sm:$0xff] }
 0x1cb   : > { %1790 = vmatprep.mubr.f32.mxu1 %v765_v58 }
 0x1cc   : > { %1791 = vmatmul.mubr.f32.vlgmr.msra.gmra.mxu1 %v766_v59 }
 0x1cd   : > { %1829 = vmatpush3.msra.mxu1 %v972_v28  ;;  %1860 = vmatprep.mubr.f32.mxu1 %v771_v61  ;;  %v1253_v61 = vld [vmem:[#allocation7 + $0x30] sm:$0xff] }
 0x1ce   : > { %1830 = vmatprep.subr.mxu1 %v971_v60 }
 0x1cf   : > { %1831 = vmatpush3.msra.mxu1 %v971_v60  ;;  %v1254_v60 = vld [vmem:[#allocation7 + $0x38] sm:$0xff] }
 0x1d0   : > { %1832 = vmatprep.subr.mxu1 %v970_v62 }
 0x1d1   : > { %1833 = vmatpush3.msra.mxu1 %v970_v62  ;;  %v1242_v62 = vld [vmem:[%s2673_s7 + $0x60] sm:$0xff] }
 0x1d2   : > { %1834 = vmatprep.subr.mxu1 %v969_v63 }
 0x1d3   : > { %1835 = vmatpush3.msra.mxu1 %v969_v63  ;;  %v1252_v63 = vld [vmem:[#allocation7 + $0x28] sm:$0xff] }
 0x1d4   : > { %1836 = vmatprep.subr.mxu1 %v968_v0 }
 0x1d5   : > { %1837 = vmatpush3.msra.mxu1 %v968_v0  ;;  %v1241_v0 = vld [vmem:[%s2673_s7 + $0x58] sm:$0xff] }
 0x1d6   : > { %1838 = vmatprep.subr.mxu1 %v967_v1 }
 0x1d7   : > { %1839 = vmatpush3.msra.mxu1 %v967_v1  ;;  %v1251_v1 = vld [vmem:[#allocation7 + $0x20] sm:$0xff] }
 0x1d8   : > { %1840 = vmatprep.subr.mxu1 %v966_v2 }
 0x1d9   : > { %1841 = vmatpush3.msra.mxu1 %v966_v2  ;;  %v1240_v2 = vld [vmem:[%s2673_s7 + $0x50] sm:$0xff] }
 0x1da   : > { %1842 = vmatprep.subr.mxu1 %v965_v3 }
 0x1db   : > { %1843 = vmatpush3.msra.mxu1 %v965_v3  ;;  %v1250_v3 = vld [vmem:[#allocation7 + $0x18] sm:$0xff] }
 0x1dc   : > { %1844 = vmatprep.subr.mxu1 %v964_v4 }
 0x1dd   : > { %1845 = vmatpush3.msra.mxu1 %v964_v4  ;;  %v1239_v4 = vld [vmem:[%s2673_s7 + $0x48] sm:$0xff] }
 0x1de   : > { %1846 = vmatprep.subr.mxu1 %v963_v5 }
 0x1df   : > { %1847 = vmatpush3.msra.mxu1 %v963_v5  ;;  %v1249_v5 = vld [vmem:[#allocation7 + $0x10] sm:$0xff] }
 0x1e0   : > { %1848 = vmatprep.subr.mxu1 %v962_v6 }
 0x1e1   : > { %1849 = vmatpush3.msra.mxu1 %v962_v6  ;;  %v1238_v6 = vld [vmem:[%s2673_s7 + $0x40] sm:$0xff] }
 0x1e2   : > { %1850 = vmatprep.subr.mxu1 %v961_v7 }
 0x1e3   : > { %1851 = vmatpush3.msra.mxu1 %v961_v7  ;;  %v1237_v7 = vld [vmem:[%s2673_s7 + $0x38] sm:$0xff] }
 0x1e4   : > { %1852 = vmatprep.subr.mxu1 %v960_v8 }
 0x1e5   : > { %1853 = vmatpush3.msra.mxu1 %v960_v8  ;;  %v1236_v8 = vld [vmem:[%s2673_s7 + $0x30] sm:$0xff] }
 0x1e6   : > { %1854 = vmatprep.subr.mxu1 %v959_v9 }
 0x1e7   : > { %1855 = vmatpush3.msra.mxu1 %v959_v9  ;;  %v1235_v9 = vld [vmem:[%s2673_s7 + $0x28] sm:$0xff] }
 0x1e8   : > { %1856 = vmatprep.subr.mxu1 %v958_v10 }
 0x1e9   : > { %1857 = vmatpush3.msra.mxu1 %v958_v10  ;;  %v1234_v10 = vld [vmem:[%s2673_s7 + $0x20] sm:$0xff] }
 0x1ea   : > { %1858 = vmatprep.subr.mxu1 %v957_v11 }
 0x1eb   : > { %1859 = vmatpush3.msra.mxu1 %v957_v11  ;;  %v1248_v11 = vld [vmem:[#allocation7 + $0x8] sm:$0xff] }
 0x1ec   : > { %1861 = vmatmul.mubr.f32.vlgmr.msra.gmra.mxu1 %v772_v13  ;;  %1889 = vmatprep.subr.mxu1 %v2202_v14  ;;  %v1247_v13 = vld [vmem:[#allocation7] sm:$0xff] }
 0x1ed   : > { %1921 = vmatprep.mubr.msk.f32.mxu1 %vm2203_vm3, %v2202_v14 }
 0x287   : > { %v1827_v16 = vpop.f32.mrf.mxu0 }
 0x289   : > { %v947_v19 = vpop.f32.mrf.mxu0 }
 0x28c   : > { %v1792_v15 = vpop.f32.mrf.mxu1 }
 0x28d   : > { %v953_v18 = vadd.f32 %v1827_v16, %v1792_v15  ;;  %v1246_v15 = vld [vmem:[%s2420_s11] ss:$2 sm:$0xff]  ;;  %v1232_v16 = vld [vmem:[%s2673_s7 + $0x10] sm:$0xff] }
 0x28e   : > { %v872_v17 = vpop.f32.mrf.mxu1 }
 0x28f   : > { %v948_v22 = vadd.f32 %v947_v19, %v872_v17  ;;  %v1231_v17 = vld [vmem:[%s2673_s7 + $0x8] sm:$0xff] }
 0x2ac   : > { %v1862_v21 = vpop.f32.mrf.mxu1 }
 0x2ad   : > { %v1049_v23 = vadd.f32 %v1862_v21, %v953_v18  ;;  %v1230_v18 = vld [vmem:[%s2673_s7] sm:$0xff] }
 0x2ae   : > { %v1039_v25 = vpop.f32.mrf.mxu1  ;;  %v1189_v21 = vld [vmem:[%s2671_s5] sm:$0x1] }
 0x2af   : > { %v1057_v26 = vmul.f32 %v1571_v20, %v1049_v23  ;;  %v1048_v28 = vadd.f32 %v1039_v25, %v948_v22  ;;  %v1578_v22 = vld [vmem:[%s2671_s5 + $0x1] sm:$0x1]  ;;  %v1197_v23 = vsub.s32 0, %v2428_v27 }
 0x2b1   : > { %v1065_v29 = vadd.f32 %v1572_v24, %v1057_v26  ;;  %v1056_v30 = vmul.f32 %v1571_v20, %v1048_v28  ;;  %v1198_v26 = vrot.slane %v1189_v21, %v1197_v23  ;;  %v1217_v28 = vrot.slane %v1578_v22, %v1197_v23 }
 0x2b3   : > { %v1064_v32 = vadd.f32 %v1572_v24, %v1056_v30  ;;  %v1067_v35 = vrot.slane %v1065_v29, 7  ;;  %v1091_v36 = vrot.slane %v1065_v29, 1  ;;  %v1580_v24 = vadd.f32 -1.0, %v1578_v22 }
 0x2b5   : > { %v1066_v37 = vrot.slane %v1064_v32, 7  ;;  %v1090_v38 = vrot.slane %v1064_v32, 1 }
 0x2b7   : > { %v1068_v40 = vsel %vm435_vm0, %v1066_v37, %v1067_v35  ;;  %v1069_v41 = vsel %vm435_vm0, %v1067_v35, %v1066_v37  ;;  %v1093_v42 = vsel %vm452_vm2, %v1091_v36, %v1090_v38  ;;  %v1092_v43 = vsel %vm452_vm2, %v1090_v38, %v1091_v36 }
 0x2b8   : > { %v1070_v44 = vmul.f32 %v1069_v41, %v2435_v31  ;;  %v1071_v45 = vmul.f32 %v1068_v40, %v2441_v34  ;;  %v1095_v47 = vmul.f32 %v1093_v42, %v2505_v57  ;;  %v1094_v50 = vmul.f32 %v1092_v43, %v2473_v46  ;;  %v1114_v31 = vld [vmem:[%s2672_s6] sm:$0xff]  ;;  %v1245_v34 = vld [vmem:[%s2673_s7 + $0x78] sm:$0xff]  ;;  %v1244_v46 = vld [vmem:[%s2673_s7 + $0x70] sm:$0xff] }
 0x2b9   : > { %1890 = vmatpush3.msra.mxu1 %v1245_v34  ;;  %v1243_v57 = vld [vmem:[%s2673_s7 + $0x68] sm:$0xff]  ;;  %v1582_v43 = vld [vmem:[#allocation8] ss:$0 sm:$0xff] }
 0x2ba   : > { %v1086_v48 = vadd.f32 %v1079_v39, %v1070_v44  ;;  %v1087_v49 = vadd.f32 %v1084_v33, %v1071_v45  ;;  %v1111_v54 = vadd.f32 %v1108_v51, %v1095_v47  ;;  %v1110_v58 = vadd.f32 %v1103_v55, %v1094_v50  ;;  %1891 = vmatprep.subr.mxu1 %v2202_v14  ;;  %v1583_v45 = vld [vmem:[#allocation8 + $0x1] ss:$0 sm:$0xff] }
 0x2bb   : > { %1892 = vmatpush3.msra.mxu1 %v1244_v46 }
 0x2bc   : > { %v1088_v52 = vmax.f32 %v1064_v32, %v1086_v48  ;;  %v1089_v53 = vmax.f32 %v1065_v29, %v1087_v49  ;;  %1893 = vmatprep.subr.mxu1 %v2202_v14  ;;  %v1221_v29 = vmul.f32 1e+30, %v1580_v24 }
 0x2bd   : > { %1894 = vmatpush3.msra.mxu1 %v1243_v57 }
 0x2be   : > { %v1113_v56 = vmax.f32 %v1089_v53, %v1111_v54  ;;  %v1112_v59 = vmax.f32 %v1088_v52, %v1110_v58  ;;  %1895 = vmatprep.subr.mxu1 %v2202_v14  ;;  %v1226_v36 = vrot.slane %v1221_v29, %v1197_v23 }
 0x2bf   : > { %1896 = vmatpush3.msra.mxu1 %v1242_v62 }
 0x2c0   : > { %1864 = vmatpush3.msra.mxu0 %v1113_v56  ;;  %1897 = vmatprep.subr.mxu1 %v2202_v14 }
 0x2c1   : > { %1865 = vmatprep.subr.mxu0 %v2202_v14  ;;  %1898 = vmatpush3.msra.mxu1 %v1241_v0 }
 0x2c2   : > { %1866 = vmatpush3.msra.mxu0 %v1112_v59  ;;  %1899 = vmatprep.subr.mxu1 %v2202_v14 }
 0x2c3   : > { %1868 = vmatmul.mubr.msk.f32.vlgmr.msra.gmra.mxu0 %vm1115_vm4, %v1114_v31  ;;  %1870 = vmatprep.subr.mxu0 %v2202_v14 }
 0x2c4   : > { %1886 = vmatprep.mubr.msk.f32.mxu0 %vm2203_vm3, %v2202_v14  ;;  %1871 = vmatpush3.msra.mxu0 %v1254_v60 }
 0x2c5   : > { %1872 = vmatprep.subr.mxu0 %v2202_v14  ;;  %1900 = vmatpush3.msra.mxu1 %v1240_v2 }
 0x2c6   : > { %1873 = vmatpush3.msra.mxu0 %v1253_v61  ;;  %1901 = vmatprep.subr.mxu1 %v2202_v14 }
 0x2c7   : > { %1874 = vmatprep.subr.mxu0 %v2202_v14  ;;  %1902 = vmatpush3.msra.mxu1 %v1239_v4 }
 0x2c8   : > { %1875 = vmatpush3.msra.mxu0 %v1252_v63  ;;  %1903 = vmatprep.subr.mxu1 %v2202_v14 }
 0x2c9   : > { %1876 = vmatprep.subr.mxu0 %v2202_v14  ;;  %1904 = vmatpush3.msra.mxu1 %v1238_v6 }
 0x2ca   : > { %1877 = vmatpush3.msra.mxu0 %v1251_v1  ;;  %1905 = vmatprep.subr.mxu1 %v2202_v14 }
 0x2cb   : > { %1878 = vmatprep.subr.mxu0 %v2202_v14  ;;  %1906 = vmatpush3.msra.mxu1 %v1237_v7 }
 0x2cc   : > { %1879 = vmatpush3.msra.mxu0 %v1250_v3  ;;  %1907 = vmatprep.subr.mxu1 %v2202_v14 }
 0x2cd   : > { %1880 = vmatprep.subr.mxu0 %v2202_v14  ;;  %1908 = vmatpush3.msra.mxu1 %v1236_v8 }
 0x2ce   : > { %1881 = vmatpush3.msra.mxu0 %v1249_v5  ;;  %1909 = vmatprep.subr.mxu1 %v2202_v14 }
 0x2cf   : > { %1882 = vmatprep.subr.mxu0 %v2202_v14  ;;  %1910 = vmatpush3.msra.mxu1 %v1235_v9 }
 0x2d0   : > { %1911 = vmatprep.subr.mxu1 %v2202_v14  ;;  %1883 = vmatpush3.msra.mxu0 %v1248_v11 }
 0x2d1   : > { %1912 = vmatpush3.msra.mxu1 %v1234_v10  ;;  %1884 = vmatprep.subr.mxu0 %v2202_v14 }
 0x2d2   : > { %1913 = vmatprep.subr.mxu1 %v2202_v14  ;;  %1885 = vmatpush3.msra.mxu0 %v1247_v13 }
 0x2d3   : > { %1914 = vmatpush3.msra.mxu1 %v1233_v12  ;;  %1887 = vmatmul.mubr.msk.f32.vlgmr.msra.gmra.mxu0 %vm484_vm1, %v1246_v15 }
 0x2d4   : > { %1915 = vmatprep.subr.mxu1 %v2202_v14 }
 0x2d5   : > { %1916 = vmatpush3.msra.mxu1 %v1232_v16 }
 0x2d6   : > { %1917 = vmatprep.subr.mxu1 %v2202_v14 }
 0x2d7   : > { %1918 = vmatpush3.msra.mxu1 %v1231_v17 }
 0x2d8   : > { %1919 = vmatprep.subr.mxu1 %v2202_v14  ;;  %v1579_v14 = vadd.f32 -1.0, %v1189_v21 }
 0x2d9   : > { %1920 = vmatpush3.msra.mxu1 %v1230_v18 }
 0x2da   : > { %v1202_v25 = vmul.f32 1e+30, %v1579_v14 }
 0x2dc   : > { %v1207_v30 = vrot.slane %v1202_v25, %v1197_v23 }
 0x383   : > { %v1185_v19 = vpop.f32.mrf.mxu0 }
 0x384   : > { %1192 = vrot.lane.b32.xlu0 %v1185_v19, %s2204_s30  ;;  %1211 = vrot.lane.b32.xlu1 %v1185_v19, %s2205_s18  ;;  %s2630_s30 = scalar_lea.hbm %s2676_s10, %s1585_s29  ;;  %s1417_s18 = scalar_lea.sflag [#allocation4], %s410_s28 }
 0x385   : > { %v1869_v20 = vpop.f32.mrf.mxu0 }
 0x393   : > { %v1324_v42 = vpop.f32.mrf.mxu0 }
 0x394   : > { %v1335_v44 = vmul.f32 %v1582_v43, %v1324_v42 }
 0x395   : > { %v1888_v27 = vpop.f32.mrf.mxu0 }
 0x396   : > { %v1344_v47 = vadd.f32 %v1583_v45, %v1335_v44 }
 0x3f6   : > { %v1193_v32 = vpop.permute.xlu0 %1192  ;;  %v1212_v33 = vpop.permute.xlu1 %1211 }
 0x3f7   : > { %v1200_v35 = vmul.f32 %v1198_v26, %v1193_v32  ;;  %v1219_v37 = vmul.f32 %v1217_v28, %v1212_v33 }
 0x3f9   : > { %v1209_v38 = vadd.f32 %v1207_v30, %v1200_v35  ;;  %v1228_v40 = vadd.f32 %v1226_v36, %v1219_v37 }
 0x3fb   : > { %v1210_v39 = vmax.f32 %v1185_v19, %v1209_v38 }
 0x3fd   : > { %v1229_v41 = vmax.f32 %v1210_v39, %v1228_v40 }
 0x3ff   : > { %1922 = vmatmul.mubr.f32.vlgmr.msra.gmra.mxu1 %v1229_v41 }
 0x4bf   : > { %v1411_v48 = vpop.f32.mrf.mxu1 }
 0x4c0   : > { %v1412_v49 = vadd.f32 %v1411_v48, %v1344_v47 }
 0x4c1   : > { %v1923_v50 = vpop.f32.mrf.mxu1 }
 0x4c2   : > { %1415 = vst.msk [vmem:[%s412_s20] sm:$0xff] %vm484_vm1, %v1412_v49 }
 0x4c3   : > { %2132 = shalt.err (!%p2129_p13)
}
 0x4c4   : > { %s2133_s25 = scalar_lea.hbm %s2630_s30, 128  ;;  %s2137_s29 = scalar_lea.hbm %s2676_s10, 256 }
 0x4c5   : > { %p2134_p9 = scmp.ne.s32.totalorder %s2630_s30, %s2133_s25  ;;  %p2138_p10 = scmp.lt.s32.totalorder %s2630_s30, %s2676_s10 }
 0x4c6   : > { %p2139_p12 = scmp.lt.s32.totalorder %s2137_s29, %s2133_s25 }
 0x4c7   : > { %p2135_p5 = pnand %p2134_p9, %p2698_p3 }
 0x4c8   : > { %p2140_p1 = por %p2139_p12, %p2138_p10 }
 0x4c9   : > { %p2136_p6 = pneg %p2135_p5 }
 0x4cb   : > { %p2141_p2 = pnand %p2140_p1, %p2136_p6 }
 0x4cd   : > { %2144 = shalt.err (!%p2141_p2)
}
 0x4ce   : > { %1940 = dma.vmem_to_hbm [thread:$0]  (%p2698_p3), %s1431_s15, 128, %s2630_s30, %s1417_s18  }
 0x4cf PF: > { %p1967_p4 = scmp.ge.s32.totalorder %s2191_s16, 2  ;;  %s1442_s11 = sand.u32 1, %s2179_s13  }
 0x4d0   : > { %p2699_p7 = scmp.ne.s32.totalorder %s2686_s24, 0  ;;  %s1443_s26 = scalar_lea.sflag [#allocation4], %s1442_s11 }
 0x4d2   : > { %p1956_p8 = pnand %p1967_p4, %p2699_p7 }
 0x4d4   : > { %p1957_p11 = pneg %p1956_p8 }
 0x4d6   : > { %2174 = dma.done.wait (%p1957_p11), %s1443_s26, 128  }
 0x4d7   : > { %2176 = vsyncadd (%p1957_p11), %s1443_s26, 4294967168  ;;  %s2700_s17 = sld [smem:[#allocation15_spill]]  ;;  %p23_p0 = scmp.ge.s32.totalorder %s2287_s19, 4  }
 0x4d8   : > { %s2701_s15 = sld [smem:[#allocation16_spill]]  ;;  %s2702_s13 = smov %s2183_s14 }
 0x4d9   : > { %s2704_s16 = smov %s2287_s19  ;;  %25 = sbr.rel (!%p23_p0) target bundleno = 6 (0x6), region = 122 }
 0x4dd   : > { %s2703_s14 = smov %s2700_s17 }
 0x4de   :  { %1448 = vsyncpa [#allocation3], 1 }
 0x4df   :  { %1450 = vsyncpa [#allocation3 + $0x1], 1 }
 0x4e0   :  { %1451 = vsyncpa [#allocation6], 1 }
 0x4e1   :  { %1452 = vsyncpa [#allocation9], 1 }
 0x4e2   :  { %1453 = vsyncpa [#allocation4], 1 }
 0x4e3   :  { %1455 = vsyncpa [#allocation4 + $0x1], 1 }

</bundles_post_ra>
